<compile_context>
chip_gen: v7x
topology: tpu7x:2x2x1
jax: 0.10.0
libtpu: 0.0.40
codegen_flags: <defaults>
</compile_context>

<pallas_src>
import math
import numpy as np

import jax
import jax.numpy as jnp
from jax.experimental import pallas as pl
from jax.experimental.pallas import tpu as pltpu

_LOG_SQRT_2PI = 0.5 * math.log(2.0 * math.pi)
_OBS_NOISE_STD = 0.01
_LOG_NOISE_STD = math.log(_OBS_NOISE_STD)
_INV_2_NOISE_VAR = 1.0 / (2.0 * _OBS_NOISE_STD * _OBS_NOISE_STD)

VMEM_SPEC = pl.BlockSpec(memory_space=pltpu.MemorySpace.VMEM)


def _dot(a, b):
    return jnp.dot(a, b, preferred_element_type=jnp.float32)


def _flow(h, t, Wf1h, wf1t, bf1, Wf2, bf2, wt, bt):
    # TODO(synk): CouplingFlow / ResNetFlow / GRUFlow come from the external
    # neural-flows package; this is a single ResNet-flow block surrogate:
    #   h + tanh(t*wt + bt) * MLP([h, t])
    hid = jnp.maximum(_dot(h, Wf1h) + t * wf1t + bf1, 0.0)
    out = _dot(hid, Wf2) + bf2
    gate = jnp.tanh(t * wt + bt)
    return h + gate * out


# ---------------------------------------------------------------------------
# Kernels
# ---------------------------------------------------------------------------
def covmap_kernel(cov_ref, W1_ref, b1_ref, W2_ref, b2_ref, h_ref):
    # covariates_map: Linear -> ReLU -> Linear -> Tanh
    x = cov_ref[...]
    hid = jnp.maximum(_dot(x, W1_ref[...]) + b1_ref[...], 0.0)
    h_ref[...] = jnp.tanh(_dot(hid, W2_ref[...]) + b2_ref[...])


def obs_scan_kernel(
        # per-step streamed inputs
        X_ref, M_ref, dt_ref, mask_ref,
        # initial hidden (constant block)
        h0_ref,
        # flow weights
        Wf1h, wf1t, bf1, Wf2, bf2, wt, bt,
        # p_model weights (single fused 2D-wide output projection)
        Wp1, bp1, Wp2, bp2,
        # GRU-observation prep weights (block-diag flattening of w_prep)
        Wx, Wm, Wlv, We, bprep, E,
        # GRUCell fused weights: [r | z | n] along the output dim
        Wih, Whh, bih, bhh,
        # outputs (all VMEM-resident across the whole grid)
        h_ref, loss1_ref, loss2_ref, nll_ref):
    s = pl.program_id(0)

    @pl.when(s == 0)
    def _init():
        h_ref[...] = h0_ref[...]
        loss1_ref[...] = jnp.zeros_like(loss1_ref)
        loss2_ref[...] = jnp.zeros_like(loss2_ref)
        nll_ref[...] = jnp.zeros_like(nll_ref)

    h_prev = h_ref[...]            # (B, H) carry
    t = dt_ref[...]                # (B, 1)
    mask = mask_ref[...]           # (B, 1) in {0, 1}: idx = where(num_obs > s)
    X = X_ref[...]                 # (B, D)
    M = M_ref[...]                 # (B, D)
    B, H = h_prev.shape
    D = X.shape[1]

    sel_h = jnp.broadcast_to(mask, (B, H)) > 0.0
    sel_d = jnp.broadcast_to(mask, (B, D)) > 0.0

    # ---- neural-flow jump applied to h[idx] only (NaN-safe merge) ----
    hf = _flow(h_prev, t, Wf1h[...], wf1t[...], bf1[...],
               Wf2[...], bf2[...], wt[...], bt[...])
    h1 = jnp.where(sel_h, hf, h_prev)

    # ---- p_model on post-flow hidden ----
    ph = jnp.maximum(_dot(h1, Wp1[...]) + bp1[...], 0.0)
    pm = _dot(ph, Wp2[...]) + bp2[...]          # (B, 2D)
    mean = pm[:, :D]
    logvar = pm[:, D:]
    inv_sigma = jnp.exp(-0.5 * logvar)          # EUP exp; no VPU divide
    error = (X - mean) * inv_sigma

    # negative log-lik losses; only rows in idx contribute
    losses = 0.5 * ((error * error + logvar + 2.0 * _LOG_SQRT_2PI) * M)
    losses = jnp.where(sel_d, losses, 0.0)
    l1_step = jnp.sum(losses, keepdims=True)    # (1, 1)
    n_idx = jnp.sum(mask, keepdims=True)        # (1, 1), >= 1 for every step
    loss1_ref[...] += l1_step
    nll_ref[...] += l1_step / (n_idx * D)       # == losses.mean() over idx rows

    # ---- prep: stack([X, mean, logvar, error]) @ w_prep, relu, * M ----
    # flattened GRU input feature index = d * prep_hidden + p (matches torch view)
    prep = (_dot(X, Wx[...]) + _dot(mean, Wm[...]) + _dot(logvar, Wlv[...]) +
            _dot(error, We[...]) + bprep[...])
    gru_in = jnp.maximum(prep, 0.0) * _dot(M, E[...])

    # ---- GRUCell(prep_hidden*input_size, H), gates fused into 2 matmuls ----
    gi = _dot(gru_in, Wih[...]) + bih[...]      # (B, 3H)
    gh = _dot(h1, Whh[...]) + bhh[...]          # (B, 3H)
    r = jax.nn.sigmoid(gi[:, :H] + gh[:, :H])
    z = jax.nn.sigmoid(gi[:, H:2 * H] + gh[:, H:2 * H])
    n = jnp.tanh(gi[:, 2 * H:] + r * gh[:, 2 * H:])
    h_gru = (1.0 - z) * n + z * h1
    h2 = jnp.where(sel_h, h_gru, h1)
    h_ref[...] = h2

    # ---- p_model on post-GRU hidden + KL(posterior || obs noise) ----
    ph2 = jnp.maximum(_dot(h2, Wp1[...]) + bp1[...], 0.0)
    pm2 = _dot(ph2, Wp2[...]) + bp2[...]
    mean2 = pm2[:, :D]
    logvar2 = pm2[:, D:]
    kl = (_LOG_NOISE_STD - 0.5 * logvar2 +
          (jnp.exp(logvar2) + (mean2 - X) ** 2) * _INV_2_NOISE_VAR - 0.5)
    kl = jnp.where(sel_d, kl * M, 0.0)
    loss2_ref[...] += jnp.sum(kl, keepdims=True)


def flow_scan_kernel(dt_ref, mask_ref, h0_ref,
                     Wf1h, wf1t, bf1, Wf2, bf2, wt, bt,
                     h_ref):
    s = pl.program_id(0)

    @pl.when(s == 0)
    def _init():
        h_ref[...] = h0_ref[...]

    h_prev = h_ref[...]
    hf = _flow(h_prev, dt_ref[...], Wf1h[...], wf1t[...], bf1[...],
               Wf2[...], bf2[...], wt[...], bt[...])
    sel = jnp.broadcast_to(mask_ref[...], h_prev.shape) > 0.0
    h_ref[...] = jnp.where(sel, hf, h_prev)


# ---------------------------------------------------------------------------
# pallas_call wrappers
# ---------------------------------------------------------------------------
_FLOW_KEYS = ('Wf1h', 'wf1t', 'bf1', 'Wf2', 'bf2', 'wt', 'bt')
_OBS_KEYS = _FLOW_KEYS + ('Wp1', 'bp1', 'Wp2', 'bp2',
                          'Wx', 'Wm', 'Wlv', 'We', 'bprep', 'E',
                          'Wih', 'Whh', 'bih', 'bhh')


def _const_spec(arr):
    # Whole array, constant block index -> DMA'd to VMEM once, resident.
    nd = arr.ndim
    return pl.BlockSpec(arr.shape, lambda s, _nd=nd: (0,) * _nd)


def _step_spec(arr):
    # (S, B, d) array, one (B, d) slab streamed per grid step.
    tail = arr.shape[1:]
    nt = len(tail)
    return pl.BlockSpec((None,) + tail, lambda s, _nt=nt: (s,) + (0,) * _nt)


def _covmap_call(cov, p):
    B = cov.shape[0]
    H = p['W2c'].shape[1]
    return pl.pallas_call(
        covmap_kernel,
        out_shape=jax.ShapeDtypeStruct((B, H), jnp.float32),
        in_specs=[VMEM_SPEC] * 5,
        out_specs=VMEM_SPEC,
    )(cov, p['W1c'], p['b1c'], p['W2c'], p['b2c'])


def _obs_scan_call(h0, X_all, M_all, dt_all, mask_all, params):
    S, B, _ = X_all.shape
    H = h0.shape[1]
    weights = tuple(params[k] for k in _OBS_KEYS)
    in_specs = ([_step_spec(X_all), _step_spec(M_all),
                 _step_spec(dt_all), _step_spec(mask_all),
                 _const_spec(h0)] + [_const_spec(w) for w in weights])
    out_shape = (jax.ShapeDtypeStruct((B, H), jnp.float32),
                 jax.ShapeDtypeStruct((1, 1), jnp.float32),
                 jax.ShapeDtypeStruct((1, 1), jnp.float32),
                 jax.ShapeDtypeStruct((1, 1), jnp.float32))
    out_specs = (pl.BlockSpec((B, H), lambda s: (0, 0)),
                 pl.BlockSpec((1, 1), lambda s: (0, 0)),
                 pl.BlockSpec((1, 1), lambda s: (0, 0)),
                 pl.BlockSpec((1, 1), lambda s: (0, 0)))
    return pl.pallas_call(
        obs_scan_kernel,
        grid=(S,),
        out_shape=out_shape,
        in_specs=in_specs,
        out_specs=out_specs,
        compiler_params=pltpu.CompilerParams(
            dimension_semantics=("arbitrary",)),
    )(X_all, M_all, dt_all, mask_all, h0, *weights)


def _flow_scan_call(h0, dt_all, mask_all, params):
    S, B, _ = dt_all.shape
    H = h0.shape[1]
    weights = tuple(params[k] for k in _FLOW_KEYS)
    in_specs = ([_step_spec(dt_all), _step_spec(mask_all), _const_spec(h0)]
                + [_const_spec(w) for w in weights])
    return pl.pallas_call(
        flow_scan_kernel,
        grid=(S,),
        out_shape=jax.ShapeDtypeStruct((B, H), jnp.float32),
        in_specs=in_specs,
        out_specs=pl.BlockSpec((B, H), lambda s: (0, 0)),
        compiler_params=pltpu.CompilerParams(
            dimension_semantics=("arbitrary",)),
    )(dt_all, mask_all, h0, *weights)


# ---------------------------------------------------------------------------
# Parameter init (deterministic, mirrors the shapes in the PyTorch __init__)
# ---------------------------------------------------------------------------
def init_params(key, input_size, hidden_dim, p_hidden, prep_hidden,
                cov_size, cov_hidden, flow_hidden):
    D, H, P = input_size, hidden_dim, prep_hidden
    keys = jax.random.split(key, 16)
    ki = iter(keys)

    def xavier(k, shape):
        bound = math.sqrt(6.0 / (shape[0] + shape[1]))
        return jax.random.uniform(k, shape, jnp.float32, -bound, bound)

    def unif(k, shape, bound):
        return jax.random.uniform(k, shape, jnp.float32, -bound, bound)

    p = {}
    # covariates_map: Linear(cov_size, cov_hidden) -> ReLU -> Linear(cov_hidden, H) -> Tanh
    p['W1c'] = xavier(next(ki), (cov_size, cov_hidden))
    p['b1c'] = jnp.full((1, cov_hidden), 0.05, jnp.float32)
    p['W2c'] = xavier(next(ki), (cov_hidden, H))
    p['b2c'] = jnp.full((1, H), 0.05, jnp.float32)

    # p_model: Linear(H, p_hidden) -> ReLU -> Linear(p_hidden, 2*D)  (single fused out proj)
    p['Wp1'] = xavier(next(ki), (H, p_hidden))
    p['bp1'] = jnp.full((1, p_hidden), 0.05, jnp.float32)
    p['Wp2'] = xavier(next(ki), (p_hidden, 2 * D))
    p['bp2'] = jnp.full((1, 2 * D), 0.05, jnp.float32)

    # flow surrogate (single ResNet-flow block)
    p['Wf1h'] = xavier(next(ki), (H, flow_hidden))
    p['wf1t'] = xavier(next(ki), (1, flow_hidden))
    p['bf1'] = jnp.zeros((1, flow_hidden), jnp.float32)
    p['Wf2'] = xavier(next(ki), (flow_hidden, H))
    p['bf2'] = jnp.zeros((1, H), jnp.float32)
    p['wt'] = xavier(next(ki), (1, H))
    p['bt'] = jnp.zeros((1, H), jnp.float32)

    # GRUObservationCellLogvar prep weights: w_prep (D, 4, P), bias_prep = 0.1
    # flattened into block-diagonal matrices so the kernel uses plain matmuls.
    std = math.sqrt(2.0 / (4 + P))
    w_prep = std * np.asarray(jax.random.normal(next(ki), (D, 4, P)), np.float32)
    Wk = np.zeros((4, D, D * P), np.float32)
    E = np.zeros((D, D * P), np.float32)
    for d in range(D):
        E[d, d * P:(d + 1) * P] = 1.0
        for k in range(4):
            Wk[k, d, d * P:(d + 1) * P] = w_prep[d, k]
    p['Wx'], p['Wm'], p['Wlv'], p['We'] = (jnp.asarray(Wk[i]) for i in range(4))
    p['E'] = jnp.asarray(E)
    p['bprep'] = jnp.full((1, D * P), 0.1, jnp.float32)

    # GRUCell(P*D, H): torch default init uniform(-1/sqrt(H), 1/sqrt(H)),
    # gates fused as [r | z | n] along the output dim.
    kk = 1.0 / math.sqrt(H)
    p['Wih'] = unif(next(ki), (D * P, 3 * H), kk)
    p['Whh'] = unif(next(ki), (H, 3 * H), kk)
    p['bih'] = unif(next(ki), (1, 3 * H), kk)
    p['bhh'] = unif(next(ki), (1, 3 * H), kk)
    return p


# ---------------------------------------------------------------------------
# Forward (mirrors NNFOwithBayesianJumps.forward, return_path=False)
# ---------------------------------------------------------------------------
def nnfo_forward(params, times, num_obs, X, M, delta_t, cov,
                 val_times=None, mixing=0.1):
    del delta_t  # unused on this forward path in the reference code
    B = cov.shape[0]
    D = X.shape[1]
    total_obs = X.shape[0]

    h = _covmap_call(cov, params)

    num_obs = num_obs.astype(jnp.int32)
    max_obs = int(np.max(np.asarray(num_obs)))

    # Pre-gather per-step observation slabs once (dense (S, B, *) tensors).
    steps = jnp.arange(max_obs, dtype=jnp.int32)
    mask_all = (num_obs[None, :] > steps[:, None]).astype(jnp.float32)[:, :, None]
    offsets = jnp.concatenate(
        [jnp.zeros((1,), jnp.int32), jnp.cumsum(num_obs).astype(jnp.int32)])[:-1]
    gidx = jnp.clip(offsets[None, :] + steps[:, None], 0, total_obs - 1)
    X_all = X[gidx]                                    # (S, B, D)
    M_all = M[gidx]                                    # (S, B, D)
    t_cur = jnp.transpose(times[:, :max_obs]).astype(jnp.float32)       # (S, B)
    t_prev = jnp.concatenate([jnp.zeros((1, B), jnp.float32), t_cur[:-1]], axis=0)
    dt_all = (t_cur - t_prev)[:, :, None]              # (S, B, 1)

    h, l1, l2, nll_sum = _obs_scan_call(h, X_all, M_all, dt_all, mask_all, params)
    loss_1 = l1[0, 0]
    loss_2 = l2[0, 0]
    nll_mean = nll_sum[0, 0] / max_obs                 # mean over per-step losses.mean()

    if val_times is not None:
        val_t, val_numobs = val_times
        val_numobs = val_numobs.astype(jnp.int32)
        max_val = int(np.max(np.asarray(val_numobs)))
        vsteps = jnp.arange(max_val, dtype=jnp.int32)
        vmask_all = (val_numobs[None, :] > vsteps[:, None]).astype(jnp.float32)[:, :, None]
        last_idx = jnp.maximum(num_obs - 1, 0)[:, None]
        last_obs_t = jnp.take_along_axis(times, last_idx, axis=1)[:, 0]
        last_obs_t = jnp.where(num_obs > 0, last_obs_t, 0.0)
        vt_cur = jnp.transpose(val_t[:, :max_val]).astype(jnp.float32)
        vt_prev = jnp.concatenate([last_obs_t[None, :], vt_cur[:-1]], axis=0)
        vdt_all = (vt_cur - vt_prev)[:, :, None]
        h = _flow_scan_call(h, vdt_all, vmask_all, params)
        # TODO(synk): return_path / path_p accumulation not implemented
        # (forward called with return_path=False).

    loss = loss_1 + mixing * loss_2
    return h, loss, nll_mean, loss_1, loss_2


# ---------------------------------------------------------------------------
if __name__ == "__main__":
    B, D, H = 8, 4, 32
    prep_hidden, p_hidden = 4, 16
    cov_size, cov_hidden = 8, 16
    flow_hidden = 32
    mixing = 0.1

    key = jax.random.PRNGKey(0)
    kp, kx, km, kc = jax.random.split(key, 4)
    params = init_params(kp, D, H, p_hidden, prep_hidden,
                         cov_size, cov_hidden, flow_hidden)

    num_obs_np = np.array([3, 2, 4, 1, 3, 2, 4, 2], dtype=np.int32)
    total_obs = int(num_obs_np.sum())
    max_obs = int(num_obs_np.max())

    X = jax.random.normal(kx, (total_obs, D), jnp.float32)
    M = (jax.random.uniform(km, (total_obs, D)) > 0.3).astype(jnp.float32)
    cov = jax.random.normal(kc, (B, cov_size), jnp.float32)

    times_np = np.zeros((B, max_obs), np.float32)
    for b in range(B):
        for k in range(num_obs_np[b]):
            times_np[b, k] = 0.1 * (k + 1) + 0.01 * b
    times = jnp.asarray(times_np)
    num_obs = jnp.asarray(num_obs_np)

    # two validation times per sample, after all observation times
    val_t = jnp.asarray(np.tile(np.array([[1.0, 1.5]], np.float32), (B, 1)))
    val_numobs = jnp.full((B,), 2, dtype=jnp.int32)

    h, loss, nll, loss_1, loss_2 = nnfo_forward(
        params, times, num_obs, X, M, 0.05, cov,
        val_times=(val_t, val_numobs), mixing=mixing)
    jax.block_until_ready((h, loss, nll, loss_1, loss_2))
    assert np.all(np.isfinite(np.asarray(h))), "hidden state not finite"
    assert np.isfinite(np.asarray(loss)), "loss not finite"
    print("KERNEL_OK")
</pallas_src>

<mosaic_0001>
module attributes {stable_mosaic.version = 11 : i64} {
  func.func @covmap_kernel(%arg0: memref<8x8xf32, #tpu.memory_space<vmem>>, %arg1: memref<8x16xf32, #tpu.memory_space<vmem>>, %arg2: memref<1x16xf32, #tpu.memory_space<vmem>>, %arg3: memref<16x32xf32, #tpu.memory_space<vmem>>, %arg4: memref<1x32xf32, #tpu.memory_space<vmem>>, %arg5: memref<8x32xf32, #tpu.memory_space<vmem>>) attributes {dimension_semantics = [], scalar_prefetch = 0 : i64, scratch_operands = 0 : i64, tpu.core_type = #tpu.core_type<tc>} {
    %c0 = arith.constant 0 : index
    %c0_0 = arith.constant 0 : index
    %0 = vector.load %arg0[%c0, %c0_0] : memref<8x8xf32, #tpu.memory_space<vmem>>, vector<8x8xf32>
    %c0_1 = arith.constant 0 : index
    %c0_2 = arith.constant 0 : index
    %1 = vector.load %arg1[%c0_1, %c0_2] : memref<8x16xf32, #tpu.memory_space<vmem>>, vector<8x16xf32>
    %cst = arith.constant dense<0.000000e+00> : vector<8x16xf32>
    %2 = tpu.matmul %0, %1, %cst {dimension_numbers = #tpu.dot_dimension_numbers<[1], [0], [0], [1], [0, 0, 1, 1], [], []>} : vector<8x8xf32>, vector<8x16xf32>, vector<8x16xf32> -> vector<8x16xf32>
    %c0_3 = arith.constant 0 : index
    %c0_4 = arith.constant 0 : index
    %3 = vector.load %arg2[%c0_3, %c0_4] : memref<1x16xf32, #tpu.memory_space<vmem>>, vector<1x16xf32>
    %4 = vector.broadcast %3 : vector<1x16xf32> to vector<8x16xf32>
    %5 = arith.addf %2, %4 : vector<8x16xf32>
    %cst_5 = arith.constant 0.000000e+00 : f32
    %6 = vector.broadcast %cst_5 : f32 to vector<8x16xf32>
    %7 = arith.maximumf %5, %6 : vector<8x16xf32>
    %c0_6 = arith.constant 0 : index
    %c0_7 = arith.constant 0 : index
    %8 = vector.load %arg3[%c0_6, %c0_7] : memref<16x32xf32, #tpu.memory_space<vmem>>, vector<16x32xf32>
    %cst_8 = arith.constant dense<0.000000e+00> : vector<8x32xf32>
    %9 = tpu.matmul %7, %8, %cst_8 {dimension_numbers = #tpu.dot_dimension_numbers<[1], [0], [0], [1], [0, 0, 1, 1], [], []>} : vector<8x16xf32>, vector<16x32xf32>, vector<8x32xf32> -> vector<8x32xf32>
    %c0_9 = arith.constant 0 : index
    %c0_10 = arith.constant 0 : index
    %10 = vector.load %arg4[%c0_9, %c0_10] : memref<1x32xf32, #tpu.memory_space<vmem>>, vector<1x32xf32>
    %11 = vector.broadcast %10 : vector<1x32xf32> to vector<8x32xf32>
    %12 = arith.addf %9, %11 : vector<8x32xf32>
    %13 = math.tanh %12 : vector<8x32xf32>
    %c0_11 = arith.constant 0 : index
    %c0_12 = arith.constant 0 : index
    %14 = vector.load %arg5[%c0_11, %c0_12] : memref<8x32xf32, #tpu.memory_space<vmem>>, vector<8x32xf32>
    tpu.vector_store %arg5[%c0_11, %c0_12], %13 {strides = array<i32>} : memref<8x32xf32, #tpu.memory_space<vmem>>, vector<8x32xf32>,
    return
  }
}

</mosaic_0001>

<bundles_post_ra>
// kernel: tpu_custom_call.1
= control target key start
LH: loop header
LB: loop body
LE: loop exit
PB: predicated region body
PF: predicated region fallthrough
CT: control target
= control target key end

     0   :  { %10 = vsyncpa [#allocation3], 0  ;;  %s466_s0 = inlined_call_operand.hbm [shape: f32[8,8], index: 0, kind: input, shape index: {}]   ;;  %s467_s1 = inlined_call_operand.hbm [shape: f32[8,16], index: 1, kind: input, shape index: {}]   ;;  %s468_s2 = inlined_call_operand.vmem [shape: f32[1,16], index: 2, kind: input, shape index: {}]   ;;  %s469_s3 = inlined_call_operand.hbm [shape: f32[16,32], index: 3, kind: input, shape index: {}]   ;;  %s470_s4 = inlined_call_operand.vmem [shape: f32[1,32], index: 4, kind: input, shape index: {}]   ;;  %s471_s5 = inlined_call_operand.hbm [shape: f32[8,32], index: 5, kind: output, shape index: {}]  }
   0x1   :  { %11 = vsyncpa [#allocation6], 0 }
   0x2   :  { %12 = vsyncpa [#allocation4], 0  ;;  %s373_s18 = smov [#allocation5]   ;;  %s374_s20 = smov [#allocation2]  }
   0x3   :  { %s29_s19 = sshll.u32 %s373_s18, 4  ;;  %s19_s21 = sshll.u32 %s374_s20, 4  ;;  %s30_s19 = int_to_ptr.vmem [resolvable:$true] %s29_s19  ;;  %s20_s21 = int_to_ptr.vmem [resolvable:$true] %s19_s21 }
   0x4   :  { %s279_s24 = scalar_lea.hbm %s467_s1, 128 }
   0x5   :  { %p280_p0 = scmp.ne.s32.totalorder %s467_s1, %s279_s24  ;;  %p283_p1 = scmp.lt.u32.totalorder %s279_s24, %s467_s1 }
   0x7   :  { %p285_p2 = pnand %p283_p1, %p280_p0 }
   0x9   :  { %288 = shalt.err (!%p285_p2)
}
   0xa   :  { %s289_s29 = scalar_lea.vmem %s30_s19, 128  ;;  %p294_p4 = scmp.lt.s32.totalorder %s30_s19, %s30_s19 }
   0xb   :  { %p290_p3 = scmp.ne.s32.totalorder %s30_s19, %s289_s29  ;;  %p295_p5 = scmp.lt.s32.totalorder %s289_s29, %s289_s29 }
   0xd   :  { %p296_p6 = por %p295_p5, %p294_p4 }
   0xf   :  { %p297_p7 = pnand %p296_p6, %p290_p3 }
  0x11   :  { %300 = shalt.err (!%p297_p7)
}
  0x12   :  { %32 = dma.hbm_to_vmem [thread:$0]  %s467_s1, 128, %s30_s19, [#allocation6]  }
  0x13   :  { %s301_s9 = scalar_lea.hbm %s466_s0, 128 }
  0x14   :  { %p302_p8 = scmp.ne.s32.totalorder %s466_s0, %s301_s9  ;;  %p305_p9 = scmp.lt.u32.totalorder %s301_s9, %s466_s0 }
  0x16   :  { %p307_p10 = pnand %p305_p9, %p302_p8 }
  0x18   :  { %310 = shalt.err (!%p307_p10)
}
  0x19   :  { %s311_s14 = scalar_lea.vmem %s20_s21, 128  ;;  %p316_p12 = scmp.lt.s32.totalorder %s20_s21, %s20_s21 }
  0x1a   :  { %p312_p11 = scmp.ne.s32.totalorder %s20_s21, %s311_s14  ;;  %p317_p13 = scmp.lt.s32.totalorder %s311_s14, %s311_s14 }
  0x1c   :  { %p318_p0 = por %p317_p13, %p316_p12 }
  0x1e   :  { %p319_p1 = pnand %p318_p0, %p312_p11 }
  0x20   :  { %322 = shalt.err (!%p319_p1)
}
  0x21   :  { %22 = dma.hbm_to_vmem [thread:$0]  %s466_s0, 128, %s20_s21, [#allocation3]  }
  0x22   :  { %s375_s16 = smov [#allocation7]   ;;  %s323_s20 = scalar_lea.hbm %s469_s3, 256 }
  0x23   :  { %s40_s17 = sshll.u32 %s375_s16, 4  ;;  %p324_p2 = scmp.ne.s32.totalorder %s469_s3, %s323_s20  ;;  %s41_s17 = int_to_ptr.vmem [resolvable:$true] %s40_s17 }
  0x24   :  { %p327_p3 = scmp.lt.u32.totalorder %s323_s20, %s469_s3 }
  0x26   :  { %p329_p4 = pnand %p327_p3, %p324_p2 }
  0x28   :  { %332 = shalt.err (!%p329_p4)
}
  0x29   :  { %s333_s26 = scalar_lea.vmem %s41_s17, 256  ;;  %p338_p6 = scmp.lt.s32.totalorder %s41_s17, %s41_s17 }
  0x2a   :  { %p334_p5 = scmp.ne.s32.totalorder %s41_s17, %s333_s26  ;;  %p339_p7 = scmp.lt.s32.totalorder %s333_s26, %s333_s26 }
  0x2c   :  { %p340_p8 = por %p339_p7, %p338_p6 }
  0x2e   :  { %p341_p9 = pnand %p340_p8, %p334_p5 }
  0x30   :  { %344 = shalt.err (!%p341_p9)
}
  0x31   :  { %s376_s0 = smov 128   ;;  %s377_s21 = smov 8  }
  0x32   :  { %46 = dma.hbm_to_vmem [thread:$0]  %s469_s3, 256, %s41_s17, [#allocation6], %s376_s0, %s376_s0, %s377_s21  }
  0x33   :  { %367 = dma.done.wait [#allocation3], 128  }
  0x34   :  { %368 = vsyncadd [#allocation3], 4294967168 }
  0x35   :  { %369 = dma.done.wait [#allocation6], 384  }
  0x36   :  { %370 = vsyncadd [#allocation6], 4294966912  ;;  %v378_v0 = vmov 0.0   ;;  %vm379_vm0 = vmmov 0   ;;  %vm67_vm1 = vcmask 64512   ;;  %v59_v1 = vld [vmem:[#allocation5] sm:$0xff] }
  0x37   :  { %253 = vmatprep.subr.mxu0 %v378_v0  ;;  %255 = vmatprep.mubr.msk.f32.mxu0 %vm379_vm0, %v378_v0  ;;  %v58_v2 = vld [vmem:[#allocation2] sm:$0xff]  ;;  %v142_v3 = vld [vmem:[#allocation7] sm:$0xff]  ;;  %v143_v4 = vld [vmem:[#allocation7 + $0x8] sm:$0xff]  ;;  %v380_v6 = vmov 0.0|0.0   ;;  %vm151_vm2 = vcmask 130048   ;;  %s381_s7 = smov [#allocation8]  }
  0x38   :  { %262 = vmatprep.mubr.msk.f32.mxu1 %vm379_vm0, %v378_v0  ;;  %254 = vmatpush3.msra.mxu0 %v59_v1  ;;  %v266_v5 = vpack.c.bf16 %v143_v4, %v142_v3  ;;  %v244_v7 = vld [vmem:[%s468_s2] ss:$0 sm:$0xff]  ;;  %s234_s8 = sshll.u32 %s381_s7, 4  ;;  %vm226_vm3 = vcmask 261120   ;;  %s235_s8 = int_to_ptr.vmem [resolvable:$true] %s234_s8 }
  0x39   :  { %256 = vmatmul.mubr.msk.f32.vlgmr.msra.gmra.mrb[0].mxu0 %vm67_vm1, %v58_v2  ;;  %265 = vmatprep.subr.bf16.mxu1 %v380_v6  ;;  %v246_v12 = vld [vmem:[%s470_s4] ss:$0 sm:$0xff]  ;;  %s345_s2 = scalar_lea.vmem %s235_s8, 128  ;;  %p350_p11 = scmp.lt.s32.totalorder %s235_s8, %s235_s8 }
  0x3a   :  { %267 = vmatpush3.bf16.msra.mxu1 %v266_v5  ;;  %p346_p10 = scmp.ne.s32.totalorder %s235_s8, %s345_s2  ;;  %p351_p12 = scmp.lt.s32.totalorder %s345_s2, %s345_s2 }
  0x3c   :  { %p352_p13 = por %p351_p12, %p350_p11 }
  0x3e   :  { %p353_p0 = pnand %p352_p13, %p346_p10 }
 0x10c   :  { %v137_v8 = vpop.f32.mrb[0].mxu0 }
 0x10d   :  { %v138_v9 = vadd.f32 %v244_v7, %v137_v8  ;;  %v257_v10 = vpop.f32.mrb[1].mxu0 }
 0x10f   :  { %v141_v11 = vmax.f32 %v138_v9, 0.0 }
 0x111   :  { %263 = vmatmul.mubr.msk.f32.vlgmr.msra.gmra.mrb[0].mxu1 %vm151_vm2, %v141_v11 }
 0x1e4   :  { %v221_v13 = vpop.f32.mrb[0].mxu1 }
 0x1e5   :  { %v222_v14 = vadd.f32 %v246_v12, %v221_v13  ;;  %v264_v15 = vpop.f32.mrb[1].mxu1 }
 0x1e7   :  { %277 = vtanh.f32 %v222_v14 }
 0x1f1   :  { %v278_v16 = vpop.eup %277 }
 0x1f2   :  { %227 = vst.msk [vmem:[#allocation8] sm:$0xff] %vm226_vm3, %v278_v16 }
 0x1f3   :  { %356 = shalt.err (!%p353_p0)
}
 0x1f4   :  { %s357_s4 = scalar_lea.hbm %s471_s5, 128 }
 0x1f5   :  { %p358_p1 = scmp.ne.s32.totalorder %s471_s5, %s357_s4  ;;  %p361_p2 = scmp.lt.u32.totalorder %s357_s4, %s471_s5 }
 0x1f7   :  { %p363_p3 = pnand %p361_p2, %p358_p1 }
 0x1f9   :  { %366 = shalt.err (!%p363_p3)
}
 0x1fa   :  { %237 = dma.vmem_to_hbm [thread:$0]  %s235_s8, 128, %s471_s5, [#allocation4]  }
 0x1fb   :  { %371 = dma.done.wait [#allocation4], 128  }
 0x1fc   :  { %372 = vsyncadd [#allocation4], 4294967168 }
 0x1fd   :  { %241 = vsyncpa [#allocation3], 1 }
 0x1fe   :  { %242 = vsyncpa [#allocation6], 1 }
 0x1ff   :  { %243 = vsyncpa [#allocation4], 1 }

</bundles_post_ra>
